<compile_context>
chip_gen: v5e
topology: v5e:2x2
jax: 0.10.0
libtpu: 0.0.40
codegen_flags: <defaults>
</compile_context>

<pallas_src>
import jax
import jax.numpy as jnp
from jax.experimental import pallas as pl
from jax.experimental.pallas import tpu as pltpu


def _round_up(x, m):
    return (x + m - 1) // m * m


def _mlp_kernel(x_ref, w1_ref, b1_ref, w2_ref, b2_ref, o_ref):
    # fc1: (TILE_N, F) @ (F, H) on the MXU, bf16 operands, fp32 accumulation.
    h = jnp.dot(x_ref[...], w1_ref[...], preferred_element_type=jnp.float32)
    # Bias add + ReLU in fp32 on the VPU.
    h = jnp.maximum(h + b1_ref[...], 0.0)
    # Dropout (eval mode) -> identity.
    # fc2: cast hidden back to bf16 for the second MXU pass, fp32 accumulation.
    out = jnp.dot(h.astype(w2_ref.dtype), w2_ref[...],
                  preferred_element_type=jnp.float32)
    o_ref[...] = (out + b2_ref[...]).astype(o_ref.dtype)


def prototypical_network_forward(x, w1, b1, w2, b2, *, tile_n=512,
                                 compute_dtype=jnp.bfloat16):
    """x: (N, F); w1: (F, H); b1: (H,); w2: (H, O); b2: (O,). Returns (N, O) f32."""
    N, F = x.shape
    H = w1.shape[1]
    O = w2.shape[1]

    # Lane-align everything to 128 (full vregs, lane-dense output stores).
    F_pad = _round_up(F, 128)
    H_pad = _round_up(H, 128)
    O_pad = _round_up(O, 128)
    N_pad = _round_up(N, 128)
    tile_n = min(tile_n, N_pad)
    N_pad = _round_up(N_pad, tile_n)

    # Zero-pad: zeros contribute nothing to the matmuls; padded rows/cols are
    # sliced off after the call.
    x_p = jnp.zeros((N_pad, F_pad), compute_dtype).at[:N, :F].set(
        x.astype(compute_dtype))
    w1_p = jnp.zeros((F_pad, H_pad), compute_dtype).at[:F, :H].set(
        w1.astype(compute_dtype))
    b1_p = jnp.zeros((1, H_pad), jnp.float32).at[0, :H].set(
        b1.astype(jnp.float32))
    w2_p = jnp.zeros((H_pad, O_pad), compute_dtype).at[:H, :O].set(
        w2.astype(compute_dtype))
    b2_p = jnp.zeros((1, O_pad), jnp.float32).at[0, :O].set(
        b2.astype(jnp.float32))

    grid = (N_pad // tile_n,)

    bytes_accessed = (x_p.size * 2 + w1_p.size * 2 + w2_p.size * 2
                      + b1_p.size * 4 + b2_p.size * 4 + N_pad * O_pad * 4)

    out_padded = pl.pallas_call(
        _mlp_kernel,
        out_shape=jax.ShapeDtypeStruct((N_pad, O_pad), jnp.float32),
        grid_spec=pl.GridSpec(
            grid=grid,
            in_specs=[
                # x: one batch tile per grid step (pipelined / double-buffered).
                pl.BlockSpec((tile_n, F_pad), lambda i: (i, 0)),
                # Weights & biases: constant block index -> VMEM-resident.
                pl.BlockSpec((F_pad, H_pad), lambda i: (0, 0)),
                pl.BlockSpec((1, H_pad), lambda i: (0, 0)),
                pl.BlockSpec((H_pad, O_pad), lambda i: (0, 0)),
                pl.BlockSpec((1, O_pad), lambda i: (0, 0)),
            ],
            out_specs=pl.BlockSpec((tile_n, O_pad), lambda i: (i, 0)),
        ),
        compiler_params=pltpu.CompilerParams(
            # Batch tiles are independent -> shard across TCs on v7x megacore.
            dimension_semantics=("parallel",),
        ),
        cost_estimate=pl.CostEstimate(
            flops=2 * N_pad * (F_pad * H_pad + H_pad * O_pad),
            transcendentals=0,
            bytes_accessed=bytes_accessed,
        ),
    )(x_p, w1_p, b1_p, w2_p, b2_p)

    return out_padded[:N, :O]


if __name__ == "__main__":
    # Small shapes consistent with the module:
    #   input_size = X_temp.shape[1] -> pick 64
    #   hidden_size = 32, output_size = 16, batch = 8
    batch, input_size, hidden_size, output_size = 8, 64, 32, 16

    key = jax.random.PRNGKey(0)
    kx, kw1, kb1, kw2, kb2 = jax.random.split(key, 5)

    x = jax.random.normal(kx, (batch, input_size), dtype=jnp.float32)

    # Deterministic PyTorch-style uniform init, stored as (in, out) for x @ W.
    lim1 = 1.0 / (input_size ** 0.5)
    w1 = jax.random.uniform(kw1, (input_size, hidden_size), jnp.float32, -lim1, lim1)
    b1 = jax.random.uniform(kb1, (hidden_size,), jnp.float32, -lim1, lim1)
    lim2 = 1.0 / (hidden_size ** 0.5)
    w2 = jax.random.uniform(kw2, (hidden_size, output_size), jnp.float32, -lim2, lim2)
    b2 = jax.random.uniform(kb2, (output_size,), jnp.float32, -lim2, lim2)

    out = prototypical_network_forward(x, w1, b1, w2, b2)
    jax.block_until_ready(out)
    assert out.shape == (batch, output_size)

    # Reference matching the kernel's bf16-operand / fp32-accumulate numerics.
    xb = x.astype(jnp.bfloat16).astype(jnp.float32)
    w1b = w1.astype(jnp.bfloat16).astype(jnp.float32)
    w2b = w2.astype(jnp.bfloat16).astype(jnp.float32)
    h_ref = jnp.maximum(xb @ w1b + b1, 0.0)
    ref_bf16 = h_ref.astype(jnp.bfloat16).astype(jnp.float32) @ w2b + b2
    assert jnp.allclose(out, ref_bf16, atol=1e-3, rtol=1e-3)

    # Sanity check against the pure-fp32 reference (bf16 matmul tolerance).
    ref_f32 = jnp.maximum(x @ w1 + b1, 0.0) @ w2 + b2
    assert jnp.allclose(out, ref_f32, atol=5e-2, rtol=5e-2)

    print("KERNEL_OK")
</pallas_src>

<mosaic_0001>
module attributes {stable_mosaic.version = 11 : i64} {
  func.func @_mlp_kernel(%arg0: i32, %arg1: memref<128x128xbf16, #tpu.memory_space<vmem>>, %arg2: memref<128x128xbf16, #tpu.memory_space<vmem>>, %arg3: memref<1x128xf32, #tpu.memory_space<vmem>>, %arg4: memref<128x128xbf16, #tpu.memory_space<vmem>>, %arg5: memref<1x128xf32, #tpu.memory_space<vmem>>, %arg6: memref<128x128xf32, #tpu.memory_space<vmem>>) attributes {dimension_semantics = [#tpu.dimension_semantics<parallel>], iteration_bounds = array<i64: 1>, scalar_prefetch = 0 : i64, scratch_operands = 0 : i64, tpu.core_type = #tpu.core_type<tc>, window_params = [{transform_indices = @transform_0, window_bounds = array<i64: 128, 128>}, {pipeline_mode = #tpu.pipeline_mode<synchronous>, transform_indices = @transform_1, window_bounds = array<i64: 128, 128>}, {pipeline_mode = #tpu.pipeline_mode<synchronous>, transform_indices = @transform_2, window_bounds = array<i64: 1, 128>}, {pipeline_mode = #tpu.pipeline_mode<synchronous>, transform_indices = @transform_3, window_bounds = array<i64: 128, 128>}, {pipeline_mode = #tpu.pipeline_mode<synchronous>, transform_indices = @transform_4, window_bounds = array<i64: 1, 128>}, {transform_indices = @transform_5, window_bounds = array<i64: 128, 128>}]} {
    %c0 = arith.constant 0 : index
    %c0_0 = arith.constant 0 : index
    %0 = vector.load %arg1[%c0, %c0_0] : memref<128x128xbf16, #tpu.memory_space<vmem>>, vector<128x128xbf16>
    %c0_1 = arith.constant 0 : index
    %c0_2 = arith.constant 0 : index
    %1 = vector.load %arg2[%c0_1, %c0_2] : memref<128x128xbf16, #tpu.memory_space<vmem>>, vector<128x128xbf16>
    %cst = arith.constant dense<0.000000e+00> : vector<128x128xf32>
    %2 = tpu.matmul %0, %1, %cst {dimension_numbers = #tpu.dot_dimension_numbers<[1], [0], [0], [1], [0, 0, 1, 1], [], []>} : vector<128x128xbf16>, vector<128x128xbf16>, vector<128x128xf32> -> vector<128x128xf32>
    %c0_3 = arith.constant 0 : index
    %c0_4 = arith.constant 0 : index
    %3 = vector.load %arg3[%c0_3, %c0_4] : memref<1x128xf32, #tpu.memory_space<vmem>>, vector<1x128xf32>
    %4 = vector.broadcast %3 : vector<1x128xf32> to vector<128x128xf32>
    %5 = arith.addf %2, %4 : vector<128x128xf32>
    %cst_5 = arith.constant 0.000000e+00 : f32
    %6 = vector.broadcast %cst_5 : f32 to vector<128x128xf32>
    %7 = arith.maximumf %5, %6 : vector<128x128xf32>
    %8 = arith.truncf %7 : vector<128x128xf32> to vector<128x128xbf16>
    %c0_6 = arith.constant 0 : index
    %c0_7 = arith.constant 0 : index
    %9 = vector.load %arg4[%c0_6, %c0_7] : memref<128x128xbf16, #tpu.memory_space<vmem>>, vector<128x128xbf16>
    %cst_8 = arith.constant dense<0.000000e+00> : vector<128x128xf32>
    %10 = tpu.matmul %8, %9, %cst_8 {dimension_numbers = #tpu.dot_dimension_numbers<[1], [0], [0], [1], [0, 0, 1, 1], [], []>} : vector<128x128xbf16>, vector<128x128xbf16>, vector<128x128xf32> -> vector<128x128xf32>
    %c0_9 = arith.constant 0 : index
    %c0_10 = arith.constant 0 : index
    %11 = vector.load %arg5[%c0_9, %c0_10] : memref<1x128xf32, #tpu.memory_space<vmem>>, vector<1x128xf32>
    %12 = vector.broadcast %11 : vector<1x128xf32> to vector<128x128xf32>
    %13 = arith.addf %10, %12 : vector<128x128xf32>
    %c0_11 = arith.constant 0 : index
    %c0_12 = arith.constant 0 : index
    %14 = vector.load %arg6[%c0_11, %c0_12] : memref<128x128xf32, #tpu.memory_space<vmem>>, vector<128x128xf32>
    tpu.vector_store %arg6[%c0_11, %c0_12], %13 {strides = array<i32>} : memref<128x128xf32, #tpu.memory_space<vmem>>, vector<128x128xf32>,
    return
  }
  func.func @transform_0(%arg0: i32) -> (i32, i32) {
    %c0_i32 = arith.constant 0 : i32
    %c0_i32_0 = arith.constant 0 : i32
    return %arg0, %c0_i32 : i32, i32
  }
  func.func @transform_1(%arg0: i32) -> (i32, i32) {
    %c0_i32 = arith.constant 0 : i32
    %c0_i32_0 = arith.constant 0 : i32
    %c0_i32_1 = arith.constant 0 : i32
    return %c0_i32, %c0_i32_0 : i32, i32
  }
  func.func @transform_2(%arg0: i32) -> (i32, i32) {
    %c0_i32 = arith.constant 0 : i32
    %c0_i32_0 = arith.constant 0 : i32
    %c0_i32_1 = arith.constant 0 : i32
    return %c0_i32, %c0_i32_0 : i32, i32
  }
  func.func @transform_3(%arg0: i32) -> (i32, i32) {
    %c0_i32 = arith.constant 0 : i32
    %c0_i32_0 = arith.constant 0 : i32
    %c0_i32_1 = arith.constant 0 : i32
    return %c0_i32, %c0_i32_0 : i32, i32
  }
  func.func @transform_4(%arg0: i32) -> (i32, i32) {
    %c0_i32 = arith.constant 0 : i32
    %c0_i32_0 = arith.constant 0 : i32
    %c0_i32_1 = arith.constant 0 : i32
    return %c0_i32, %c0_i32_0 : i32, i32
  }
  func.func @transform_5(%arg0: i32) -> (i32, i32) {
    %c0_i32 = arith.constant 0 : i32
    %c0_i32_0 = arith.constant 0 : i32
    return %arg0, %c0_i32 : i32, i32
  }
}

</mosaic_0001>

<bundles_post_ra>
// kernel: tpu_custom_call.1
= control target key start
LH: loop header
LB: loop body
LE: loop exit
PB: predicated region body
PF: predicated region fallthrough
CT: control target
= control target key end

     0   :  { %10 = vsyncpa [#allocation3], 0  ;;  %s730_s0 = inlined_call_operand.hbm [shape: bf16[128,128], index: 0, kind: input, shape index: {}]   ;;  %s731_s1 = inlined_call_operand.hbm [shape: bf16[128,128], index: 1, kind: input, shape index: {}]   ;;  %s732_s2 = inlined_call_operand.vmem [shape: f32[1,128], index: 2, kind: input, shape index: {}]   ;;  %s733_s3 = inlined_call_operand.hbm [shape: bf16[128,128], index: 3, kind: input, shape index: {}]   ;;  %s734_s4 = inlined_call_operand.vmem [shape: f32[1,128], index: 4, kind: input, shape index: {}]   ;;  %s735_s5 = inlined_call_operand.hbm [shape: f32[128,128], index: 5, kind: output, shape index: {}]  }
   0x1   :  { %11 = vsyncpa [#allocation6], 0 }
   0x2   :  { %12 = vsyncpa [#allocation4], 0  ;;  %s30_s20 = sshll.u32 %s731_s1, 4  ;;  %s674_s21 = smov [#allocation5]   ;;  %s31_s20 = int_to_ptr.hbm [resolvable:$true] %s30_s20 }
   0x3   :  { %s32_s22 = sshll.u32 %s674_s21, 4  ;;  %s17_s25 = sshll.u32 %s730_s0, 4  ;;  %s33_s22 = int_to_ptr.vmem [resolvable:$true] %s32_s22  ;;  %s18_s25 = int_to_ptr.hbm [resolvable:$true] %s17_s25 }
   0x4   :  { %s675_s26 = smov 64   ;;  %s676_s27 = smov 4  }
   0x5   :  { %38 = dma.hbm_to_vmem [thread:$0]  %s31_s20, 1024, %s33_s22, [#allocation6], %s675_s26, %s675_s26, %s676_s27  }
   0x6   :  { %s677_s28 = smov [#allocation2]   ;;  %s45_s7 = sshll.u32 %s733_s3, 4  ;;  %s46_s7 = int_to_ptr.hbm [resolvable:$true] %s45_s7 }
   0x7   :  { %s19_s29 = sshll.u32 %s677_s28, 4  ;;  %s678_s1 = smov [#allocation7]   ;;  %s20_s29 = int_to_ptr.vmem [resolvable:$true] %s19_s29 }
   0x8   :  { %25 = dma.hbm_to_vmem [thread:$0]  %s18_s25, 1024, %s20_s29, [#allocation3], %s675_s26, %s675_s26, %s676_s27  }
   0x9   :  { %s47_s8 = sshll.u32 %s678_s1, 4  ;;  %s48_s8 = int_to_ptr.vmem [resolvable:$true] %s47_s8 }
   0xa   :  { %53 = dma.hbm_to_vmem [thread:$0]  %s46_s7, 1024, %s48_s8, [#allocation6], %s675_s26, %s675_s26, %s676_s27  }
   0xb   :  { %668 = dma.done.wait [#allocation3], 1024  }
   0xc   :  { %669 = vsyncadd [#allocation3], 4294966272 }
   0xd   :  { %670 = dma.done.wait [#allocation6], 2048  }
   0xe   :  { %671 = vsyncadd [#allocation6], 4294965248  ;;  %v537_v0 = vld [vmem:[#allocation5 + $0x38] sm:$0xff]  ;;  %v536_v1 = vld [vmem:[#allocation5 + $0x30] sm:$0xff]  ;;  %s412_s13 = sshll.u32 %s735_s5, 4  ;;  %s680_s14 = smov 128   ;;  %s413_s13 = int_to_ptr.hbm [resolvable:$true] %s412_s13 }
   0xf   :  { %200 = vmatpush.bf16.msra.mxu0 %v537_v0  ;;  %546 = vmatpush.bf16.msra.mxu2 %v537_v0  ;;  %v535_v2 = vld [vmem:[#allocation5 + $0x28] sm:$0xff]  ;;  %v534_v3 = vld [vmem:[#allocation5 + $0x20] sm:$0xff]  ;;  %v533_v4 = vld [vmem:[#allocation5 + $0x18] sm:$0xff]  ;;  %s681_s15 = smov 8  }
  0x10   :  { %v532_v5 = vld [vmem:[#allocation5 + $0x10] sm:$0xff]  ;;  %v531_v6 = vld [vmem:[#allocation5 + $0x8] sm:$0xff]  ;;  %v530_v7 = vld [vmem:[#allocation5] sm:$0xff] }
  0x11   :  { %v522_v8 = vld [vmem:[#allocation2] sm:$0xff]  ;;  %v523_v10 = vld [vmem:[#allocation2 + $0x8] sm:$0xff]  ;;  %v545_v12 = vld [vmem:[#allocation7 + $0x38] sm:$0xff] }
  0x12   :  { %v526_v9 = vld [vmem:[#allocation2 + $0x20] sm:$0xff]  ;;  %v527_v11 = vld [vmem:[#allocation2 + $0x28] sm:$0xff]  ;;  %341 = vmatpush.bf16.msra.mxu1 %v545_v12  ;;  %v544_v13 = vld [vmem:[#allocation7 + $0x30] sm:$0xff]  ;;  %554 = vmatpush.bf16.msra.mxu3 %v545_v12 }
  0x13   :  { %201 = vmatpush.bf16.msra.mxu0 %v536_v1  ;;  %547 = vmatpush.bf16.msra.mxu2 %v536_v1  ;;  %v543_v14 = vld [vmem:[#allocation7 + $0x28] sm:$0xff]  ;;  %v542_v15 = vld [vmem:[#allocation7 + $0x20] sm:$0xff]  ;;  %v524_v16 = vld [vmem:[#allocation2 + $0x10] sm:$0xff] }
  0x14   :  { %v528_v17 = vld [vmem:[#allocation2 + $0x30] sm:$0xff]  ;;  %v525_v18 = vld [vmem:[#allocation2 + $0x18] sm:$0xff]  ;;  %v539_v22 = vld [vmem:[#allocation7 + $0x8] sm:$0xff] }
  0x15   :  { %v529_v19 = vld [vmem:[#allocation2 + $0x38] sm:$0xff]  ;;  %v540_v21 = vld [vmem:[#allocation7 + $0x10] sm:$0xff]  ;;  %v538_v23 = vld [vmem:[#allocation7] sm:$0xff] }
  0x16   :  { %342 = vmatpush.bf16.msra.mxu1 %v544_v13  ;;  %555 = vmatpush.bf16.msra.mxu3 %v544_v13  ;;  %v541_v20 = vld [vmem:[#allocation7 + $0x18] sm:$0xff]  ;;  %v570_v25 = vld [vmem:[%s732_s2] ss:$0 sm:$0xff] }
  0x17   :  { %202 = vmatpush.bf16.msra.mxu0 %v535_v2  ;;  %548 = vmatpush.bf16.msra.mxu2 %v535_v2 }
  0x1a   :  { %343 = vmatpush.bf16.msra.mxu1 %v543_v14  ;;  %556 = vmatpush.bf16.msra.mxu3 %v543_v14 }
  0x1b   :  { %203 = vmatpush.bf16.msra.mxu0 %v534_v3  ;;  %549 = vmatpush.bf16.msra.mxu2 %v534_v3 }
  0x1e   :  { %344 = vmatpush.bf16.msra.mxu1 %v542_v15  ;;  %557 = vmatpush.bf16.msra.mxu3 %v542_v15 }
  0x1f   :  { %204 = vmatpush.bf16.msra.mxu0 %v533_v4  ;;  %550 = vmatpush.bf16.msra.mxu2 %v533_v4 }
  0x22   :  { %345 = vmatpush.bf16.msra.mxu1 %v541_v20  ;;  %558 = vmatpush.bf16.msra.mxu3 %v541_v20 }
  0x23   :  { %205 = vmatpush.bf16.msra.mxu0 %v532_v5  ;;  %551 = vmatpush.bf16.msra.mxu2 %v532_v5 }
  0x26   :  { %346 = vmatpush.bf16.msra.mxu1 %v540_v21  ;;  %559 = vmatpush.bf16.msra.mxu3 %v540_v21 }
  0x27   :  { %206 = vmatpush.bf16.msra.mxu0 %v531_v6  ;;  %552 = vmatpush.bf16.msra.mxu2 %v531_v6 }
  0x2a   :  { %347 = vmatpush.bf16.msra.mxu1 %v539_v22  ;;  %560 = vmatpush.bf16.msra.mxu3 %v539_v22 }
  0x2b   :  { %207 = vmatpush.bf16.msra.mxu0 %v530_v7  ;;  %553 = vmatpush.bf16.msra.mxu2 %v530_v7 }
  0x2e   :  { %208 = vmatmul.bf16.vlgmr.msra.gmra.mxu0 %v522_v8  ;;  %228 = vmatmul.bf16.vlgmr.msra.gmra.mxu2 %v526_v9 }
  0x2f   :  { %348 = vmatpush.bf16.msra.mxu1 %v538_v23  ;;  %561 = vmatpush.bf16.msra.mxu3 %v538_v23 }
  0x3e   :  { %213 = vmatmul.bf16.gmra.mxu0 %v523_v10  ;;  %233 = vmatmul.bf16.gmra.mxu2 %v527_v11 }
  0x4e   :  { %218 = vmatmul.bf16.gmra.mxu0 %v524_v16  ;;  %238 = vmatmul.bf16.gmra.mxu2 %v528_v17  ;;  %v571_v17 = vld [vmem:[%s734_s4] ss:$0 sm:$0xff]  ;;  %s679_s4 = smov [#allocation8]  }
  0x4f   :  { %s410_s10 = sshll.u32 %s679_s4, 4  ;;  %s411_s10 = int_to_ptr.vmem [resolvable:$true] %s410_s10 }
  0x5e   :  { %223 = vmatmul.bf16.gmra.mxu0 %v525_v18  ;;  %243 = vmatmul.bf16.gmra.mxu2 %v529_v19 }
  0xab   :  { %v209_v24 = vpop.f32.mrf.mxu0 }
  0xac   :  { %v210_v26 = vadd.f32 %v570_v25, %v209_v24 }
  0xae   :  { %v249_v29 = vmax.f32 %v210_v26, 0.0 }
  0xb1   :  { %v229_v27 = vpop.f32.mrf.mxu2 }
  0xb2   :  { %v230_v32 = vadd.f32 %v570_v25, %v229_v27 }
  0xb3   :  { %v211_v28 = vpop.f32.mrf.mxu0 }
  0xb4   :  { %v212_v30 = vadd.f32 %v570_v25, %v211_v28  ;;  %v257_v37 = vmax.f32 %v230_v32, 0.0 }
  0xb6   :  { %v250_v31 = vmax.f32 %v212_v30, 0.0 }
  0xb8   :  { %v265_v33 = vpack.c.bf16 %v250_v31, %v249_v29 }
  0xb9   :  { %v231_v34 = vpop.f32.mrf.mxu2 }
  0xba   :  { %v232_v35 = vadd.f32 %v570_v25, %v231_v34  ;;  %349 = vmatmul.bf16.vlgmr.msra.gmra.mxu1 %v265_v33 }
  0xbb   :  { %v214_v36 = vpop.f32.mrf.mxu0 }
  0xbc   :  { %v258_v38 = vmax.f32 %v232_v35, 0.0  ;;  %v215_v40 = vadd.f32 %v570_v25, %v214_v36 }
  0xbe   :  { %v269_v39 = vpack.c.bf16 %v258_v38, %v257_v37  ;;  %v251_v43 = vmax.f32 %v215_v40, 0.0 }
  0xc0   :  { %369 = vmatmul.bf16.vlgmr.msra.gmra.mxu3 %v269_v39 }
  0xc1   :  { %v234_v41 = vpop.f32.mrf.mxu2 }
  0xc2   :  { %v235_v46 = vadd.f32 %v570_v25, %v234_v41 }
  0xc3   :  { %v216_v42 = vpop.f32.mrf.mxu0 }
  0xc4   :  { %v217_v44 = vadd.f32 %v570_v25, %v216_v42  ;;  %v259_v51 = vmax.f32 %v235_v46, 0.0 }
  0xc6   :  { %v252_v45 = vmax.f32 %v217_v44, 0.0 }
  0xc8   :  { %v266_v47 = vpack.c.bf16 %v252_v45, %v251_v43 }
  0xc9   :  { %v236_v48 = vpop.f32.mrf.mxu2 }
  0xca   :  { %v237_v49 = vadd.f32 %v570_v25, %v236_v48  ;;  %354 = vmatmul.bf16.gmra.mxu1 %v266_v47 }
  0xcb   :  { %v219_v50 = vpop.f32.mrf.mxu0 }
  0xcc   :  { %v260_v52 = vmax.f32 %v237_v49, 0.0  ;;  %v220_v54 = vadd.f32 %v570_v25, %v219_v50 }
  0xce   :  { %v270_v53 = vpack.c.bf16 %v260_v52, %v259_v51  ;;  %v253_v57 = vmax.f32 %v220_v54, 0.0 }
  0xd0   :  { %374 = vmatmul.bf16.gmra.mxu3 %v270_v53 }
  0xd1   :  { %v239_v55 = vpop.f32.mrf.mxu2 }
  0xd2   :  { %v240_v60 = vadd.f32 %v570_v25, %v239_v55 }
  0xd3   :  { %v221_v56 = vpop.f32.mrf.mxu0 }
  0xd4   :  { %v222_v58 = vadd.f32 %v570_v25, %v221_v56  ;;  %v261_v1 = vmax.f32 %v240_v60, 0.0 }
  0xd6   :  { %v254_v59 = vmax.f32 %v222_v58, 0.0 }
  0xd8   :  { %v267_v61 = vpack.c.bf16 %v254_v59, %v253_v57 }
  0xd9   :  { %v241_v62 = vpop.f32.mrf.mxu2 }
  0xda   :  { %v242_v63 = vadd.f32 %v570_v25, %v241_v62  ;;  %359 = vmatmul.bf16.gmra.mxu1 %v267_v61 }
  0xdb   :  { %v224_v0 = vpop.f32.mrf.mxu0 }
  0xdc   :  { %v262_v2 = vmax.f32 %v242_v63, 0.0  ;;  %v225_v4 = vadd.f32 %v570_v25, %v224_v0 }
  0xde   :  { %v271_v3 = vpack.c.bf16 %v262_v2, %v261_v1  ;;  %v255_v7 = vmax.f32 %v225_v4, 0.0 }
  0xe0   :  { %379 = vmatmul.bf16.gmra.mxu3 %v271_v3 }
  0xe1   :  { %v244_v5 = vpop.f32.mrf.mxu2 }
  0xe2   :  { %v245_v10 = vadd.f32 %v570_v25, %v244_v5 }
  0xe3   :  { %v226_v6 = vpop.f32.mrf.mxu0 }
  0xe4   :  { %v227_v8 = vadd.f32 %v570_v25, %v226_v6  ;;  %v263_v14 = vmax.f32 %v245_v10, 0.0 }
  0xe6   :  { %v256_v9 = vmax.f32 %v227_v8, 0.0 }
  0xe8   :  { %v268_v11 = vpack.c.bf16 %v256_v9, %v255_v7 }
  0xe9   :  { %v246_v12 = vpop.f32.mrf.mxu2 }
  0xea   :  { %v247_v13 = vadd.f32 %v570_v25, %v246_v12  ;;  %364 = vmatmul.bf16.gmra.mxu1 %v268_v11 }
  0xec   :  { %v264_v15 = vmax.f32 %v247_v13, 0.0 }
  0xee   :  { %v272_v16 = vpack.c.bf16 %v264_v15, %v263_v14 }
  0xf0   :  { %384 = vmatmul.bf16.gmra.mxu3 %v272_v16 }
 0x137   :  { %v350_v18 = vpop.f32.mrf.mxu1 }
 0x138   :  { %v351_v19 = vadd.f32 %v571_v17, %v350_v18 }
 0x13a   :  { %390 = vst [vmem:[#allocation8] sm:$0xff] %v351_v19 }
 0x13f   :  { %v352_v20 = vpop.f32.mrf.mxu1 }
 0x140   :  { %v353_v21 = vadd.f32 %v571_v17, %v352_v20 }
 0x142   :  { %391 = vst [vmem:[#allocation8 + $0x8] sm:$0xff] %v353_v21 }
 0x143   :  { %v370_v22 = vpop.f32.mrf.mxu3 }
 0x144   :  { %v371_v23 = vadd.f32 %v571_v17, %v370_v22 }
 0x146   :  { %398 = vst [vmem:[#allocation8 + $0x40] sm:$0xff] %v371_v23 }
 0x147   :  { %v355_v24 = vpop.f32.mrf.mxu1 }
 0x148   :  { %v356_v25 = vadd.f32 %v571_v17, %v355_v24 }
 0x14a   :  { %392 = vst [vmem:[#allocation8 + $0x10] sm:$0xff] %v356_v25 }
 0x14b   :  { %v372_v26 = vpop.f32.mrf.mxu3 }
 0x14c   :  { %v373_v27 = vadd.f32 %v571_v17, %v372_v26 }
 0x14e   :  { %399 = vst [vmem:[#allocation8 + $0x48] sm:$0xff] %v373_v27 }
 0x14f   :  { %v357_v28 = vpop.f32.mrf.mxu1 }
 0x150   :  { %v358_v29 = vadd.f32 %v571_v17, %v357_v28 }
 0x152   :  { %393 = vst [vmem:[#allocation8 + $0x18] sm:$0xff] %v358_v29 }
 0x153   :  { %v375_v30 = vpop.f32.mrf.mxu3 }
 0x154   :  { %v376_v31 = vadd.f32 %v571_v17, %v375_v30 }
 0x156   :  { %400 = vst [vmem:[#allocation8 + $0x50] sm:$0xff] %v376_v31 }
 0x157   :  { %v360_v32 = vpop.f32.mrf.mxu1 }
 0x158   :  { %v361_v33 = vadd.f32 %v571_v17, %v360_v32 }
 0x15a   :  { %394 = vst [vmem:[#allocation8 + $0x20] sm:$0xff] %v361_v33 }
 0x15b   :  { %v377_v34 = vpop.f32.mrf.mxu3 }
 0x15c   :  { %v378_v35 = vadd.f32 %v571_v17, %v377_v34 }
 0x15e   :  { %401 = vst [vmem:[#allocation8 + $0x58] sm:$0xff] %v378_v35 }
 0x15f   :  { %v362_v36 = vpop.f32.mrf.mxu1 }
 0x160   :  { %v363_v37 = vadd.f32 %v571_v17, %v362_v36 }
 0x162   :  { %395 = vst [vmem:[#allocation8 + $0x28] sm:$0xff] %v363_v37 }
 0x163   :  { %v380_v38 = vpop.f32.mrf.mxu3 }
 0x164   :  { %v381_v39 = vadd.f32 %v571_v17, %v380_v38 }
 0x166   :  { %402 = vst [vmem:[#allocation8 + $0x60] sm:$0xff] %v381_v39 }
 0x167   :  { %v365_v40 = vpop.f32.mrf.mxu1 }
 0x168   :  { %v366_v41 = vadd.f32 %v571_v17, %v365_v40 }
 0x16a   :  { %396 = vst [vmem:[#allocation8 + $0x30] sm:$0xff] %v366_v41 }
 0x16b   :  { %v382_v42 = vpop.f32.mrf.mxu3 }
 0x16c   :  { %v383_v43 = vadd.f32 %v571_v17, %v382_v42 }
 0x16e   :  { %403 = vst [vmem:[#allocation8 + $0x68] sm:$0xff] %v383_v43 }
 0x16f   :  { %v367_v44 = vpop.f32.mrf.mxu1 }
 0x170   :  { %v368_v45 = vadd.f32 %v571_v17, %v367_v44 }
 0x172   :  { %397 = vst [vmem:[#allocation8 + $0x38] sm:$0xff] %v368_v45 }
 0x173   :  { %v385_v46 = vpop.f32.mrf.mxu3 }
 0x174   :  { %v386_v47 = vadd.f32 %v571_v17, %v385_v46 }
 0x176   :  { %404 = vst [vmem:[#allocation8 + $0x70] sm:$0xff] %v386_v47 }
 0x17b   :  { %v387_v48 = vpop.f32.mrf.mxu3 }
 0x17c   :  { %v388_v49 = vadd.f32 %v571_v17, %v387_v48 }
 0x17e   :  { %405 = vst [vmem:[#allocation8 + $0x78] sm:$0xff] %v388_v49 }
 0x17f   :  { %418 = dma.vmem_to_hbm [thread:$0]  %s411_s10, 2048, %s413_s13, [#allocation4], %s680_s14, %s680_s14, %s681_s15  }
 0x180   :  { %672 = dma.done.wait [#allocation4], 2048  }
 0x181   :  { %673 = vsyncadd [#allocation4], 4294965248 }
 0x182   :  { %423 = vsyncpa [#allocation3], 1 }
 0x183   :  { %424 = vsyncpa [#allocation6], 1 }
 0x184   :  { %425 = vsyncpa [#allocation4], 1 }

</bundles_post_ra>
